<compile_context>
chip_gen: v7x
topology: tpu7x:2x2x1
jax: 0.10.0
libtpu: 0.0.40
codegen_flags: <defaults>
</compile_context>

<pallas_src>
import functools
import math

import jax
import jax.numpy as jnp
from jax.experimental import pallas as pl
from jax.experimental.pallas import tpu as pltpu


def _round_up(v, m):
    return -(-v // m) * m


def _round_down(v, m):
    return (v // m) * m


def _norm_kernel(x_ref, alpha_ref, bias_ref, o_ref, *, inv_d, inv_denom, eps):
    # One independent LayerNorm per row. A partial final grid block just
    # normalizes whatever (unspecified) padding rows it covers; Pallas drops
    # the out-of-bounds portion of the store, so no in-kernel masking needed.
    x = x_ref[...].astype(jnp.float32)                       # (tile_rows, d)
    mean = jnp.sum(x, axis=-1, keepdims=True) * inv_d        # (tile_rows, 1)
    # torch.std default is UNBIASED (divide by d-1). (x - mean) is re-formed in
    # the output expression rather than kept as a separate tile-sized f32 temp,
    # so the compiler can fuse it and VMEM stays ~2 f32 tiles even for bf16 in.
    var = jnp.sum((x - mean) * (x - mean), axis=-1, keepdims=True) * inv_denom
    # eps is added to STD (not var), matching the PyTorch module. One exact
    # per-ROW reciprocal instead of a per-element divide; EUP/VALU have huge
    # slack in this HBM-bound kernel, so this is already on the cheap side.
    inv = pl.reciprocal(jnp.sqrt(var) + eps, approx=False)   # (tile_rows, 1)
    alpha = alpha_ref[...].astype(jnp.float32)               # (1, d)
    bias = bias_ref[...].astype(jnp.float32)                 # (1, d)
    o_ref[...] = ((x - mean) * inv * alpha + bias).astype(o_ref.dtype)


def _default_block_bytes():
    """Per-block byte target. v5e/v6e saturate their HBM roofline around
    2-4 MiB blocks; v7x-class chips (~3.2 TB/s HBM, 64 MiB VMEM/core) need
    larger blocks to keep the ~0.35 us per-step overhead small."""
    try:
        vmem = int(getattr(pltpu.get_tpu_info(), "vmem_capacity_bytes", 128 << 20))
    except Exception:  # non-TPU tracing / interpret mode etc.
        return 4 << 20
    return (6 << 20) if vmem <= (64 << 20) else (4 << 20)


def _choose_tile_rows(rows, d_model, itemsize, block_bytes, min_steps=4):
    """Sublane-aligned row tile of ~block_bytes, shaped so the grid gets at
    least `min_steps` (and preferably an even number of) steps when possible."""
    # Sub-32-bit dtypes pack along sublanes: 8 rows f32, 16 bf16, 32 int8/fp8.
    sublane = max(8, 32 // max(1, itemsize))
    row_bytes = max(1, itemsize * d_model)
    rows_al = _round_up(rows, sublane)

    # Largest sublane-aligned tile within the byte budget.
    # (If a single sublane-packed tile already exceeds the budget — extremely
    #  wide d_model — we keep it; column tiling is out of scope here.)
    t = max(sublane, _round_down(block_bytes // row_bytes, sublane))
    t = min(t, rows_al)

    def n_steps(tile):
        return -(-rows // tile)

    # Grid shaping: >= min_steps steps so the double buffer has DMA(i+1) /
    # compute(i) overlap and v7x's two TensorCores can shard the "parallel"
    # axis; an even count keeps the two cores balanced. Never shrink below one
    # sublane-packed tile and never grow past the byte budget. On 1-TC chips
    # (v5e/v6e) the extra steps only cost ~0.35 us each.
    if rows_al >= min_steps * sublane:
        steps = n_steps(t)
        want = max(steps, min_steps)
        if want % 2:
            want += 1
        if want != steps:
            t_try = max(sublane, _round_up(-(-rows_al // want), sublane))
            if t_try <= t and n_steps(t_try) >= min(steps, min_steps):
                t = t_try

    # If everything fits in one block anyway, use the exact row count so the
    # single block equals the full array extent (no padded partial block).
    if t >= rows:
        t = rows
    return t


def norm_forward(x, alpha, bias, eps=1e-6, tile_rows=None, block_bytes=None):
    """x: (..., d_model), alpha/bias: (d_model,)."""
    orig_shape = x.shape
    d_model = orig_shape[-1]
    rows = int(math.prod(orig_shape[:-1]))
    itemsize = jnp.dtype(x.dtype).itemsize

    # Scoped-VMEM cap we are willing to request: covers v5e's small 16 MiB
    # default scoped limit, leaves headroom under v7x's 64 MiB physical VMEM.
    vmem_cap = 48 << 20

    if tile_rows is None:
        bb = block_bytes if block_bytes is not None else _default_block_bytes()
        # Per-input-block VMEM footprint factor: x-in + out double-buffered
        # (4x input-block bytes) plus ~2 f32 tile temporaries
        # (8/itemsize x input-block bytes). Clamp the budget so it all fits.
        factor = 4 + 8 // max(1, itemsize)
        bb = min(bb, max(1 << 20, (vmem_cap - (6 << 20)) // factor))
        tile_rows = _choose_tile_rows(rows, d_model, itemsize, bb)

    x2 = x.reshape(rows, d_model)
    alpha2 = alpha.reshape(1, d_model)
    bias2 = bias.reshape(1, d_model)

    # No padding / slicing: Pallas handles the final partial block itself
    # (out-of-bounds writes dropped), so unaligned row counts cost no extra
    # HBM passes over x or out.
    num_tiles = pl.cdiv(rows, tile_rows)

    # Explicit VMEM budget: x/out blocks double-buffered, ~2 f32 tile temps,
    # params counted once (constant block index => fetched once), + headroom.
    block_bytes_actual = tile_rows * d_model * itemsize
    param_bytes = d_model * (
        jnp.dtype(alpha.dtype).itemsize + jnp.dtype(bias.dtype).itemsize
    )
    f32_tmp_bytes = 2 * tile_rows * d_model * 4
    vmem_needed = 4 * block_bytes_actual + 2 * param_bytes + f32_tmp_bytes + (4 << 20)
    vmem_limit = int(min(vmem_cap, max(16 << 20, vmem_needed)))

    # torch.std(unbiased=True) on a single element is NaN — keep that semantic.
    inv_denom = (1.0 / (d_model - 1)) if d_model > 1 else float("nan")
    kernel = functools.partial(
        _norm_kernel, inv_d=1.0 / d_model, inv_denom=inv_denom, eps=float(eps)
    )

    out = pl.pallas_call(
        kernel,
        out_shape=jax.ShapeDtypeStruct((rows, d_model), x.dtype),
        grid_spec=pltpu.PrefetchScalarGridSpec(
            num_scalar_prefetch=0,
            grid=(num_tiles,),
            in_specs=[
                pl.BlockSpec((tile_rows, d_model), lambda i: (i, 0)),
                # Constant block index: Pallas skips the re-DMA after step 0.
                pl.BlockSpec((1, d_model), lambda i: (0, 0)),
                pl.BlockSpec((1, d_model), lambda i: (0, 0)),
            ],
            out_specs=pl.BlockSpec((tile_rows, d_model), lambda i: (i, 0)),
        ),
        compiler_params=pltpu.CompilerParams(
            dimension_semantics=("parallel",),
            vmem_limit_bytes=vmem_limit,
        ),
    )(x2, alpha2, bias2)

    return out.reshape(orig_shape)


def _reference(x, alpha, bias, eps):
    mean = jnp.mean(x, axis=-1, keepdims=True)
    std = jnp.std(x, axis=-1, keepdims=True, ddof=1)  # unbiased, like torch.std
    return alpha * (x - mean) / (std + eps) + bias


if __name__ == "__main__":
    key = jax.random.PRNGKey(0)

    # d_model = 128 keeps the output lane-dense (full 128-lane vreg width =>
    # unmasked stores), which measurements show is the biggest single lever.
    batch, seq, d_model = 2, 8, 128
    x = jax.random.normal(key, (batch, seq, d_model), dtype=jnp.float32)
    alpha = jnp.ones((d_model,), dtype=jnp.float32)   # nn.Parameter(torch.ones)
    bias = jnp.zeros((d_model,), dtype=jnp.float32)   # nn.Parameter(torch.zeros)

    out = norm_forward(x, alpha, bias, eps=1e-6)
    jax.block_until_ready(out)
    ref = _reference(x, alpha, bias, 1e-6)
    assert jnp.allclose(out, ref, atol=1e-5, rtol=1e-5), "mismatch vs reference"

    # Row count (3*5 = 15) not divisible by the sublane-aligned tile:
    # exercises the padding-free partial-block path (no jnp.pad / slice).
    x2 = jax.random.normal(jax.random.PRNGKey(1), (3, 5, d_model), dtype=jnp.float32)
    out2 = norm_forward(x2, alpha, bias, eps=1e-6)
    jax.block_until_ready(out2)
    ref2 = _reference(x2, alpha, bias, 1e-6)
    assert jnp.allclose(out2, ref2, atol=1e-5, rtol=1e-5), "tail mismatch"

    # Narrow d_model (< 128): still correct, just lane-masked stores (see TODO).
    d_small = 32
    x3 = jax.random.normal(jax.random.PRNGKey(2), (2, 8, d_small), dtype=jnp.float32)
    a3 = jnp.ones((d_small,), dtype=jnp.float32)
    b3 = jnp.zeros((d_small,), dtype=jnp.float32)
    out3 = norm_forward(x3, a3, b3, eps=1e-6)
    jax.block_until_ready(out3)
    ref3 = _reference(x3, a3, b3, 1e-6)
    assert jnp.allclose(out3, ref3, atol=1e-5, rtol=1e-5), "narrow-d mismatch"

    print("KERNEL_OK")
</pallas_src>

<mosaic_0001>
module attributes {stable_mosaic.version = 11 : i64} {
  func.func @_norm_kernel(%arg0: i32, %arg1: memref<16x128xf32, #tpu.memory_space<vmem>>, %arg2: memref<1x128xf32, #tpu.memory_space<vmem>>, %arg3: memref<1x128xf32, #tpu.memory_space<vmem>>, %arg4: memref<16x128xf32, #tpu.memory_space<vmem>>) attributes {dimension_semantics = [#tpu.dimension_semantics<parallel>], iteration_bounds = array<i64: 1>, scalar_prefetch = 0 : i64, scratch_operands = 0 : i64, tpu.core_type = #tpu.core_type<tc>, window_params = [{transform_indices = @transform_0, window_bounds = array<i64: 16, 128>}, {pipeline_mode = #tpu.pipeline_mode<synchronous>, transform_indices = @transform_1, window_bounds = array<i64: 1, 128>}, {pipeline_mode = #tpu.pipeline_mode<synchronous>, transform_indices = @transform_2, window_bounds = array<i64: 1, 128>}, {transform_indices = @transform_3, window_bounds = array<i64: 16, 128>}]} {
    %c0 = arith.constant 0 : index
    %c0_0 = arith.constant 0 : index
    %0 = vector.load %arg1[%c0, %c0_0] : memref<16x128xf32, #tpu.memory_space<vmem>>, vector<16x128xf32>
    %cst = arith.constant dense<0.000000e+00> : vector<16xf32>
    %1 = vector.multi_reduction <add>, %0, %cst [1] : vector<16x128xf32> to vector<16xf32>
    %2 = vector.shape_cast %1 : vector<16xf32> to vector<16x1xf32>
    %cst_1 = arith.constant 7.812500e-03 : f32
    %3 = vector.broadcast %cst_1 : f32 to vector<16x1xf32>
    %4 = arith.mulf %2, %3 : vector<16x1xf32>
    %5 = vector.broadcast %4 : vector<16x1xf32> to vector<16x128xf32>
    %6 = arith.subf %0, %5 : vector<16x128xf32>
    %7 = vector.broadcast %4 : vector<16x1xf32> to vector<16x128xf32>
    %8 = arith.subf %0, %7 : vector<16x128xf32>
    %9 = arith.mulf %6, %8 : vector<16x128xf32>
    %cst_2 = arith.constant dense<0.000000e+00> : vector<16xf32>
    %10 = vector.multi_reduction <add>, %9, %cst_2 [1] : vector<16x128xf32> to vector<16xf32>
    %11 = vector.shape_cast %10 : vector<16xf32> to vector<16x1xf32>
    %cst_3 = arith.constant 0.00787401571 : f32
    %12 = vector.broadcast %cst_3 : f32 to vector<16x1xf32>
    %13 = arith.mulf %11, %12 : vector<16x1xf32>
    %14 = math.sqrt %13 : vector<16x1xf32>
    %cst_4 = arith.constant 9.99999997E-7 : f32
    %15 = vector.broadcast %cst_4 : f32 to vector<16x1xf32>
    %16 = arith.addf %14, %15 : vector<16x1xf32>
    %17 = tpu.reciprocal %16 : vector<16x1xf32> -> vector<16x1xf32>
    %c0_5 = arith.constant 0 : index
    %c0_6 = arith.constant 0 : index
    %18 = vector.load %arg2[%c0_5, %c0_6] : memref<1x128xf32, #tpu.memory_space<vmem>>, vector<1x128xf32>
    %c0_7 = arith.constant 0 : index
    %c0_8 = arith.constant 0 : index
    %19 = vector.load %arg3[%c0_7, %c0_8] : memref<1x128xf32, #tpu.memory_space<vmem>>, vector<1x128xf32>
    %20 = vector.broadcast %4 : vector<16x1xf32> to vector<16x128xf32>
    %21 = arith.subf %0, %20 : vector<16x128xf32>
    %22 = vector.broadcast %17 : vector<16x1xf32> to vector<16x128xf32>
    %23 = arith.mulf %21, %22 : vector<16x128xf32>
    %24 = vector.broadcast %18 : vector<1x128xf32> to vector<16x128xf32>
    %25 = arith.mulf %23, %24 : vector<16x128xf32>
    %26 = vector.broadcast %19 : vector<1x128xf32> to vector<16x128xf32>
    %27 = arith.addf %25, %26 : vector<16x128xf32>
    %c0_9 = arith.constant 0 : index
    %c0_10 = arith.constant 0 : index
    %28 = vector.load %arg4[%c0_9, %c0_10] : memref<16x128xf32, #tpu.memory_space<vmem>>, vector<16x128xf32>
    tpu.vector_store %arg4[%c0_9, %c0_10], %27 {strides = array<i32>} : memref<16x128xf32, #tpu.memory_space<vmem>>, vector<16x128xf32>,
    return
  }
  func.func @transform_0(%arg0: i32) -> (i32, i32) {
    %c0_i32 = arith.constant 0 : i32
    %c0_i32_0 = arith.constant 0 : i32
    return %arg0, %c0_i32 : i32, i32
  }
  func.func @transform_1(%arg0: i32) -> (i32, i32) {
    %c0_i32 = arith.constant 0 : i32
    %c0_i32_0 = arith.constant 0 : i32
    %c0_i32_1 = arith.constant 0 : i32
    return %c0_i32, %c0_i32_0 : i32, i32
  }
  func.func @transform_2(%arg0: i32) -> (i32, i32) {
    %c0_i32 = arith.constant 0 : i32
    %c0_i32_0 = arith.constant 0 : i32
    %c0_i32_1 = arith.constant 0 : i32
    return %c0_i32, %c0_i32_0 : i32, i32
  }
  func.func @transform_3(%arg0: i32) -> (i32, i32) {
    %c0_i32 = arith.constant 0 : i32
    %c0_i32_0 = arith.constant 0 : i32
    return %arg0, %c0_i32 : i32, i32
  }
}

</mosaic_0001>

<bundles_post_ra>
// kernel: tpu_custom_call.1
= control target key start
LH: loop header
LB: loop body
LE: loop exit
PB: predicated region body
PF: predicated region fallthrough
CT: control target
= control target key end

     0   :  { %8 = vsyncpa [#allocation3], 0  ;;  %s226_s0 = inlined_call_operand.hbm [shape: f32[16,128], index: 0, kind: input, shape index: {}]   ;;  %s227_s1 = inlined_call_operand.vmem [shape: f32[1,128], index: 1, kind: input, shape index: {}]   ;;  %s228_s2 = inlined_call_operand.vmem [shape: f32[1,128], index: 2, kind: input, shape index: {}]   ;;  %s229_s3 = inlined_call_operand.hbm [shape: f32[16,128], index: 3, kind: output, shape index: {}]  }
   0x1   :  { %9 = vsyncpa [#allocation4], 0  ;;  %s166_s12 = smov [#allocation2]   ;;  %s118_s16 = scalar_lea.hbm %s226_s0, 256 }
   0x2   :  { %s15_s13 = sshll.u32 %s166_s12, 4  ;;  %p119_p0 = scmp.ne.s32.totalorder %s226_s0, %s118_s16  ;;  %s16_s13 = int_to_ptr.vmem [resolvable:$true] %s15_s13 }
   0x3   :  { %p122_p1 = scmp.lt.u32.totalorder %s118_s16, %s226_s0 }
   0x5   :  { %p124_p2 = pnand %p122_p1, %p119_p0 }
   0x7   :  { %127 = shalt.err (!%p124_p2)
}
   0x8   :  { %s128_s21 = scalar_lea.vmem %s16_s13, 256  ;;  %p133_p4 = scmp.lt.s32.totalorder %s16_s13, %s16_s13 }
   0x9   :  { %p129_p3 = scmp.ne.s32.totalorder %s16_s13, %s128_s21  ;;  %p134_p5 = scmp.lt.s32.totalorder %s128_s21, %s128_s21 }
   0xb   :  { %p135_p6 = por %p134_p5, %p133_p4 }
   0xd   :  { %p136_p7 = pnand %p135_p6, %p129_p3 }
   0xf   :  { %139 = shalt.err (!%p136_p7)
}
  0x10   :  { %s167_s22 = smov 128   ;;  %s168_s23 = smov 8  }
  0x11   :  { %21 = dma.hbm_to_vmem [thread:$0]  %s226_s0, 256, %s16_s13, [#allocation3], %s167_s22, %s167_s22, %s168_s23  }
  0x12   :  { %162 = dma.done.wait [#allocation3], 256  }
  0x13   :  { %163 = vsyncadd [#allocation3], 4294967040  ;;  %v29_v0 = vld [vmem:[#allocation2] sm:$0xff]  ;;  %v30_v1 = vld [vmem:[#allocation2 + $0x8] sm:$0xff]  ;;  %s169_s29 = smov [#allocation5]  }
  0x14   :  { %31 = vadd.xlane.f32.xlu0 %v29_v0  ;;  %v104_v27 = vld [vmem:[%s227_s1] ss:$0 sm:$0xff]  ;;  %s92_s30 = sshll.u32 %s169_s29, 4  ;;  %s93_s30 = int_to_ptr.vmem [resolvable:$true] %s92_s30 }
  0x15   :  { %v105_v29 = vld [vmem:[%s228_s2] ss:$0 sm:$0xff]  ;;  %s140_s4 = scalar_lea.vmem %s93_s30, 256  ;;  %p145_p9 = scmp.lt.s32.totalorder %s93_s30, %s93_s30 }
  0x16   :  { %p141_p8 = scmp.ne.s32.totalorder %s93_s30, %s140_s4  ;;  %p146_p10 = scmp.lt.s32.totalorder %s140_s4, %s140_s4 }
  0x18   :  { %33 = vadd.xlane.f32.xlu0 %v30_v1  ;;  %p147_p11 = por %p146_p10, %p145_p9 }
  0x1a   :  { %p148_p12 = pnand %p147_p11, %p141_p8 }
  0xa1   :  { %v32_v2 = vpop.xlane.xlu0 %31 }
  0xa2   :  { %v35_v3 = vmul.f32 0.0078125, %v32_v2 }
  0xa4   :  { %v37_v4 = vsub.f32 %v29_v0, %v35_v3 }
  0xa5   :  { %v34_v5 = vpop.xlane.xlu0 %33 }
  0xa6   :  { %v36_v6 = vmul.f32 0.0078125, %v34_v5  ;;  %v39_v7 = vmul.f32 %v37_v4, %v37_v4 }
  0xa8   :  { %v38_v8 = vsub.f32 %v30_v1, %v36_v6  ;;  %41 = vadd.xlane.f32.xlu1 %v39_v7 }
  0xaa   :  { %v40_v9 = vmul.f32 %v38_v8, %v38_v8 }
  0xac   :  { %43 = vadd.xlane.f32.xlu1 %v40_v9 }
 0x135   :  { %v42_v10 = vpop.xlane.xlu1 %41 }
 0x136   :  { %v45_v11 = vmul.f32 0.007874016, %v42_v10 }
 0x138   :  { %110 = vrsqrt.f32 %v45_v11  ;;  %vm49_vm0 = vcmp.eq.f32.partialorder %v45_v11, inf  ;;  %v52_v16 = vand.u32 2147483648, %v45_v11  ;;  %vm51_vm1 = vcmp.eq.f32.partialorder %v45_v11, 0.0 }
 0x139   :  { %v44_v12 = vpop.xlane.xlu1 %43 }
 0x13a   :  { %v46_v13 = vmul.f32 0.007874016, %v44_v12 }
 0x13c   :  { %112 = vrsqrt.f32 %v46_v13  ;;  %vm56_vm2 = vcmp.eq.f32.partialorder %v46_v13, inf  ;;  %v59_v22 = vand.u32 2147483648, %v46_v13  ;;  %vm58_vm3 = vcmp.eq.f32.partialorder %v46_v13, 0.0 }
 0x142   :  { %v111_v14 = vpop.eup %110 }
 0x143   :  { %v48_v15 = vmul.f32 %v111_v14, %v45_v11 }
 0x145   :  { %v50_v17 = vsel %vm49_vm0, %v45_v11, %v48_v15 }
 0x146   :  { %v113_v18 = vpop.eup %112  ;;  %v53_v19 = vsel %vm51_vm1, %v52_v16, %v50_v17 }
 0x147   :  { %v55_v20 = vmul.f32 %v113_v18, %v46_v13  ;;  %v61_v21 = vadd.f32 1e-06, %v53_v19 }
 0x149   :  { %v57_v23 = vsel %vm56_vm2, %v46_v13, %v55_v20  ;;  %114 = vrcp.f32 %v61_v21 }
 0x14a   :  { %v60_v24 = vsel %vm58_vm3, %v59_v22, %v57_v23 }
 0x14b   :  { %v62_v25 = vadd.f32 1e-06, %v60_v24 }
 0x14d   :  { %116 = vrcp.f32 %v62_v25 }
 0x153   :  { %v115_v26 = vpop.eup %114 }
 0x154   :  { %v67_v28 = vmul.f32 %v115_v26, %v37_v4 }
 0x156   :  { %v75_v30 = vmul.f32 %v104_v27, %v67_v28 }
 0x157   :  { %v117_v31 = vpop.eup %116 }
 0x158   :  { %v68_v32 = vmul.f32 %v117_v31, %v38_v8  ;;  %v83_v33 = vadd.f32 %v105_v29, %v75_v30 }
 0x15a   :  { %v76_v34 = vmul.f32 %v104_v27, %v68_v32  ;;  %85 = vst [vmem:[#allocation5] sm:$0xff] %v83_v33 }
 0x15c   :  { %v84_v35 = vadd.f32 %v105_v29, %v76_v34 }
 0x15e   :  { %86 = vst [vmem:[#allocation5 + $0x8] sm:$0xff] %v84_v35 }
 0x15f   :  { %151 = shalt.err (!%p148_p12)
}
 0x160   :  { %s152_s5 = scalar_lea.hbm %s229_s3, 256 }
 0x161   :  { %p153_p13 = scmp.ne.s32.totalorder %s229_s3, %s152_s5  ;;  %p156_p0 = scmp.lt.u32.totalorder %s152_s5, %s229_s3 }
 0x163   :  { %p158_p1 = pnand %p156_p0, %p153_p13 }
 0x165   :  { %161 = shalt.err (!%p158_p1)
}
 0x166   :  { %98 = dma.vmem_to_hbm [thread:$0]  %s93_s30, 256, %s229_s3, [#allocation4], %s167_s22, %s167_s22, %s168_s23  }
 0x167   :  { %164 = dma.done.wait [#allocation4], 256  }
 0x168   :  { %165 = vsyncadd [#allocation4], 4294967040 }
 0x169   :  { %102 = vsyncpa [#allocation3], 1 }
 0x16a   :  { %103 = vsyncpa [#allocation4], 1 }

</bundles_post_ra>
